<compile_context>
chip_gen: v5e
topology: v5e:2x2
jax: 0.10.0
libtpu: 0.0.40
codegen_flags: <defaults>
</compile_context>

<pallas_src>
import functools

import jax
import jax.numpy as jnp
from jax.experimental import pallas as pl
from jax.experimental.pallas import tpu as pltpu

_TARGET_BLOCK_BYTES = 2 * 1024 * 1024  # per-input block (Pallas double-buffers)
_LANE = 128
_SUBLANE = 8


def _dice_partials_kernel(x_ref, t_ref, out_ref, pt_acc, p_acc, t_acc, *,
                          block_rows, cols, blocks_per_part, total, needs_mask):
    part = pl.program_id(0)
    step = pl.program_id(1)

    @pl.when(step == 0)
    def _():
        pt_acc[...] = jnp.zeros_like(pt_acc)
        p_acc[...] = jnp.zeros_like(p_acc)
        t_acc[...] = jnp.zeros_like(t_acc)

    p = jax.nn.sigmoid(x_ref[...].astype(jnp.float32))
    t = t_ref[...].astype(jnp.float32)

    if needs_mask:
        # Mask out padded / out-of-bounds / phantom-block elements based on
        # the logical (unclamped) position of this block.
        blk = part * blocks_per_part + step
        row0 = blk * block_rows
        row_ids = row0 + jax.lax.broadcasted_iota(jnp.int32, (block_rows, cols), 0)
        col_ids = jax.lax.broadcasted_iota(jnp.int32, (block_rows, cols), 1)
        full_rows = total // cols
        rem_cols = total % cols
        mask = (row_ids < full_rows) | ((row_ids == full_rows) & (col_ids < rem_cols))
        p = jnp.where(mask, p, 0.0)
        t = jnp.where(mask, t, 0.0)

    pt = p * t

    def fold(v):
        # (block_rows, cols) -> (8, cols) partial, VPU-only (layout-preserving
        # reshape + adds across separate vregs; no cross-lane work per step).
        if block_rows > _SUBLANE and block_rows % _SUBLANE == 0:
            return jnp.sum(v.reshape(block_rows // _SUBLANE, _SUBLANE, cols), axis=0)
        return v

    pt_acc[...] += fold(pt)
    p_acc[...] += fold(p)
    t_acc[...] += fold(t)

    @pl.when(step == pl.num_programs(1) - 1)
    def _():
        # Single full reduction per part; scalar math is finished in the wrapper.
        out_ref[0, 0] = jnp.sum(pt_acc[...])
        out_ref[0, 1] = jnp.sum(p_acc[...])
        out_ref[0, 2] = jnp.sum(t_acc[...])


def dice_loss(logits: jax.Array, targets: jax.Array, eps: float = 1e-09) -> jax.Array:
    assert logits.shape == targets.shape
    total = int(logits.size)

    # Flatten to 1-D in native dtype (no pre-cast: kernel casts on load).
    x = logits.reshape(-1)
    t = targets.reshape(-1)

    # Lane-dense layout: pick cols (multiple of 128) dividing total if possible,
    # otherwise pad to a multiple of 128 (masking in-kernel keeps it exact).
    cols = 0
    for c in (1024, 512, 256, 128):
        if total % c == 0:
            cols = c
            break
    if cols == 0:
        cols = _LANE
        pad = pl.cdiv(total, cols) * cols - total
        x = jnp.pad(x, (0, pad))
        t = jnp.pad(t, (0, pad))

    rows = x.shape[0] // cols
    x2 = x.reshape(rows, cols)
    t2 = t.reshape(rows, cols)

    # ~2 MiB per input block, sublane-aligned rows.
    itemsize = jnp.dtype(logits.dtype).itemsize
    block_rows_target = max(
        _SUBLANE,
        (_TARGET_BLOCK_BYTES // (cols * itemsize)) // _SUBLANE * _SUBLANE)
    if rows >= _SUBLANE:
        block_rows = min(block_rows_target, (rows // _SUBLANE) * _SUBLANE)
    else:
        block_rows = rows  # full-extent block (legal even if < 8 sublanes)

    num_blocks = pl.cdiv(rows, block_rows)
    num_parts = 2 if num_blocks >= 2 else 1       # 2-TC split on v7x, no-op elsewhere
    blocks_per_part = pl.cdiv(num_blocks, num_parts)

    # Mask needed if padded cols, ragged last block, or phantom blocks exist.
    needs_mask = (num_parts * blocks_per_part * block_rows * cols) != total

    def in_index_map(pidx, sidx):
        b = pidx * blocks_per_part + sidx
        # Clamp so phantom blocks re-read the last real block (masked out in-kernel)
        # instead of requesting a fully out-of-bounds window.
        return (jnp.minimum(b, num_blocks - 1), 0)

    acc_rows = block_rows if block_rows < _SUBLANE else _SUBLANE

    kernel = functools.partial(
        _dice_partials_kernel,
        block_rows=block_rows,
        cols=cols,
        blocks_per_part=blocks_per_part,
        total=total,
        needs_mask=needs_mask,
    )

    partials = pl.pallas_call(
        kernel,
        out_shape=jax.ShapeDtypeStruct((num_parts, 3), jnp.float32),
        grid_spec=pltpu.PrefetchScalarGridSpec(
            num_scalar_prefetch=0,
            grid=(num_parts, blocks_per_part),
            in_specs=[
                pl.BlockSpec((block_rows, cols), in_index_map),
                pl.BlockSpec((block_rows, cols), in_index_map),
            ],
            out_specs=pl.BlockSpec((1, 3), lambda pidx, sidx: (pidx, 0),
                                   memory_space=pltpu.SMEM),
            scratch_shapes=[
                pltpu.VMEM((acc_rows, cols), jnp.float32),  # sum(p * t) partials
                pltpu.VMEM((acc_rows, cols), jnp.float32),  # sum(p) partials
                pltpu.VMEM((acc_rows, cols), jnp.float32),  # sum(t) partials
            ],
        ),
        compiler_params=pltpu.CompilerParams(
            dimension_semantics=("parallel", "arbitrary"),
            vmem_limit_bytes=32 * 1024 * 1024,
        ),
    )(x2, t2)

    sums = jnp.sum(partials, axis=0)
    intersection = 2.0 * sums[0]
    union = sums[1] + sums[2]
    # NOTE: eps only in the numerator, matching the PyTorch module exactly.
    return 1.0 - (intersection + eps) / union


def dice_loss_ref(logits, targets, eps=1e-09):
    num = logits.shape[0]
    p = jax.nn.sigmoid(logits.astype(jnp.float32)).reshape(num, -1)
    t = targets.astype(jnp.float32).reshape(num, -1)
    intersection = 2.0 * jnp.sum(p * t)
    union = jnp.sum(p) + jnp.sum(t)
    return 1.0 - (intersection + eps) / union


if __name__ == "__main__":
    key = jax.random.PRNGKey(0)
    k1, k2, k3, k4 = jax.random.split(key, 4)

    # Primary small shape consistent with the module's conv-style inputs.
    N, C, H, W = 2, 4, 16, 16
    logits = jax.random.normal(k1, (N, C, H, W), dtype=jnp.float32)
    targets = jax.random.bernoulli(k2, p=0.3, shape=(N, C, H, W)).astype(jnp.float32)

    loss = jax.block_until_ready(dice_loss(logits, targets))
    ref = jax.block_until_ready(dice_loss_ref(logits, targets))
    assert jnp.allclose(loss, ref, atol=1e-5, rtol=1e-5), (loss, ref)

    # Secondary non-128-aligned shape to exercise the padded/masked path.
    logits2 = jax.random.normal(k3, (2, 3, 17, 19), dtype=jnp.float32)
    targets2 = jax.random.bernoulli(k4, p=0.4, shape=(2, 3, 17, 19)).astype(jnp.float32)
    loss2 = jax.block_until_ready(dice_loss(logits2, targets2))
    ref2 = jax.block_until_ready(dice_loss_ref(logits2, targets2))
    assert jnp.allclose(loss2, ref2, atol=1e-5, rtol=1e-5), (loss2, ref2)

    print("KERNEL_OK")
</pallas_src>

<mosaic_0001>
module attributes {stable_mosaic.version = 11 : i64} {
  func.func @_dice_partials_kernel(%arg0: i32, %arg1: i32, %arg2: memref<2x1024xf32, #tpu.memory_space<vmem>>, %arg3: memref<2x1024xf32, #tpu.memory_space<vmem>>, %arg4: memref<1x3xf32, #tpu.memory_space<smem>>, %arg5: memref<2x1024xf32, #tpu.memory_space<vmem>>, %arg6: memref<2x1024xf32, #tpu.memory_space<vmem>>, %arg7: memref<2x1024xf32, #tpu.memory_space<vmem>>) attributes {dimension_semantics = [#tpu.dimension_semantics<parallel>, #tpu.dimension_semantics<arbitrary>], iteration_bounds = array<i64: 1, 1>, scalar_prefetch = 0 : i64, scratch_operands = 3 : i64, tpu.core_type = #tpu.core_type<tc>, window_params = [{transform_indices = @transform_0, window_bounds = array<i64: 2, 1024>}, {transform_indices = @transform_1, window_bounds = array<i64: 2, 1024>}, {transform_indices = @transform_2, window_bounds = array<i64: 1, 3>}]} {
    %c0_i32 = arith.constant 0 : i32
    %0 = arith.cmpi eq, %arg1, %c0_i32 : i32
    %1 = arith.extui %0 : i1 to i32
    %c0_i32_0 = arith.constant 0 : i32
    %2 = arith.cmpi ne, %1, %c0_i32_0 : i32
    scf.if %2 {
      %cst_18 = arith.constant 0.000000e+00 : f32
      %23 = vector.broadcast %cst_18 : f32 to vector<2x1024xf32>
      %c0_19 = arith.constant 0 : index
      %c0_20 = arith.constant 0 : index
      %24 = vector.load %arg5[%c0_19, %c0_20] : memref<2x1024xf32, #tpu.memory_space<vmem>>, vector<2x1024xf32>
      tpu.vector_store %arg5[%c0_19, %c0_20], %23 {strides = array<i32>} : memref<2x1024xf32, #tpu.memory_space<vmem>>, vector<2x1024xf32>,
      %cst_21 = arith.constant 0.000000e+00 : f32
      %25 = vector.broadcast %cst_21 : f32 to vector<2x1024xf32>
      %c0_22 = arith.constant 0 : index
      %c0_23 = arith.constant 0 : index
      %26 = vector.load %arg6[%c0_22, %c0_23] : memref<2x1024xf32, #tpu.memory_space<vmem>>, vector<2x1024xf32>
      tpu.vector_store %arg6[%c0_22, %c0_23], %25 {strides = array<i32>} : memref<2x1024xf32, #tpu.memory_space<vmem>>, vector<2x1024xf32>,
      %cst_24 = arith.constant 0.000000e+00 : f32
      %27 = vector.broadcast %cst_24 : f32 to vector<2x1024xf32>
      %c0_25 = arith.constant 0 : index
      %c0_26 = arith.constant 0 : index
      %28 = vector.load %arg7[%c0_25, %c0_26] : memref<2x1024xf32, #tpu.memory_space<vmem>>, vector<2x1024xf32>
      tpu.vector_store %arg7[%c0_25, %c0_26], %27 {strides = array<i32>} : memref<2x1024xf32, #tpu.memory_space<vmem>>, vector<2x1024xf32>,
    } else {
    }
    %c0 = arith.constant 0 : index
    %c0_1 = arith.constant 0 : index
    %3 = vector.load %arg2[%c0, %c0_1] : memref<2x1024xf32, #tpu.memory_space<vmem>>, vector<2x1024xf32>
    %4 = arith.negf %3 : vector<2x1024xf32>
    %5 = math.exp %4 : vector<2x1024xf32>
    %cst = arith.constant 1.000000e+00 : f32
    %6 = vector.broadcast %cst : f32 to vector<2x1024xf32>
    %7 = arith.addf %6, %5 : vector<2x1024xf32>
    %8 = arith.divf %6, %7 : vector<2x1024xf32>
    %c0_2 = arith.constant 0 : index
    %c0_3 = arith.constant 0 : index
    %9 = vector.load %arg3[%c0_2, %c0_3] : memref<2x1024xf32, #tpu.memory_space<vmem>>, vector<2x1024xf32>
    %10 = arith.mulf %8, %9 : vector<2x1024xf32>
    %c0_4 = arith.constant 0 : index
    %c0_5 = arith.constant 0 : index
    %11 = vector.load %arg5[%c0_4, %c0_5] : memref<2x1024xf32, #tpu.memory_space<vmem>>, vector<2x1024xf32>
    %12 = arith.addf %11, %10 : vector<2x1024xf32>
    %c0_6 = arith.constant 0 : index
    %c0_7 = arith.constant 0 : index
    %13 = vector.load %arg5[%c0_6, %c0_7] : memref<2x1024xf32, #tpu.memory_space<vmem>>, vector<2x1024xf32>
    tpu.vector_store %arg5[%c0_6, %c0_7], %12 {strides = array<i32>} : memref<2x1024xf32, #tpu.memory_space<vmem>>, vector<2x1024xf32>,
    %c0_8 = arith.constant 0 : index
    %c0_9 = arith.constant 0 : index
    %14 = vector.load %arg6[%c0_8, %c0_9] : memref<2x1024xf32, #tpu.memory_space<vmem>>, vector<2x1024xf32>
    %15 = arith.addf %14, %8 : vector<2x1024xf32>
    %c0_10 = arith.constant 0 : index
    %c0_11 = arith.constant 0 : index
    %16 = vector.load %arg6[%c0_10, %c0_11] : memref<2x1024xf32, #tpu.memory_space<vmem>>, vector<2x1024xf32>
    tpu.vector_store %arg6[%c0_10, %c0_11], %15 {strides = array<i32>} : memref<2x1024xf32, #tpu.memory_space<vmem>>, vector<2x1024xf32>,
    %c0_12 = arith.constant 0 : index
    %c0_13 = arith.constant 0 : index
    %17 = vector.load %arg7[%c0_12, %c0_13] : memref<2x1024xf32, #tpu.memory_space<vmem>>, vector<2x1024xf32>
    %18 = arith.addf %17, %9 : vector<2x1024xf32>
    %c0_14 = arith.constant 0 : index
    %c0_15 = arith.constant 0 : index
    %19 = vector.load %arg7[%c0_14, %c0_15] : memref<2x1024xf32, #tpu.memory_space<vmem>>, vector<2x1024xf32>
    tpu.vector_store %arg7[%c0_14, %c0_15], %18 {strides = array<i32>} : memref<2x1024xf32, #tpu.memory_space<vmem>>, vector<2x1024xf32>,
    %c0_i32_16 = arith.constant 0 : i32
    %20 = arith.cmpi eq, %arg1, %c0_i32_16 : i32
    %21 = arith.extui %20 : i1 to i32
    %c0_i32_17 = arith.constant 0 : i32
    %22 = arith.cmpi ne, %21, %c0_i32_17 : i32
    scf.if %22 {
      %c0_18 = arith.constant 0 : index
      %c0_19 = arith.constant 0 : index
      %23 = vector.load %arg5[%c0_18, %c0_19] : memref<2x1024xf32, #tpu.memory_space<vmem>>, vector<2x1024xf32>
      %24 = vector.shape_cast %23 : vector<2x1024xf32> to vector<1x2x1024xf32>
      %cst_20 = arith.constant dense<0.000000e+00> : vector<1xf32>
      %25 = vector.multi_reduction <add>, %24, %cst_20 [1, 2] : vector<1x2x1024xf32> to vector<1xf32>
      %26 = vector.shape_cast %25 : vector<1xf32> to vector<1x1x1xf32>
      %27 = vector.extract %26[0, 0, 0] : f32 from vector<1x1x1xf32>
      %c0_21 = arith.constant 0 : index
      %c0_22 = arith.constant 0 : index
      %28 = memref.load %arg4[%c0_21, %c0_22] : memref<1x3xf32, #tpu.memory_space<smem>>
      memref.store %27, %arg4[%c0_21, %c0_22] : memref<1x3xf32, #tpu.memory_space<smem>>
      %c0_23 = arith.constant 0 : index
      %c0_24 = arith.constant 0 : index
      %29 = vector.load %arg6[%c0_23, %c0_24] : memref<2x1024xf32, #tpu.memory_space<vmem>>, vector<2x1024xf32>
      %30 = vector.shape_cast %29 : vector<2x1024xf32> to vector<1x2x1024xf32>
      %cst_25 = arith.constant dense<0.000000e+00> : vector<1xf32>
      %31 = vector.multi_reduction <add>, %30, %cst_25 [1, 2] : vector<1x2x1024xf32> to vector<1xf32>
      %32 = vector.shape_cast %31 : vector<1xf32> to vector<1x1x1xf32>
      %33 = vector.extract %32[0, 0, 0] : f32 from vector<1x1x1xf32>
      %c0_26 = arith.constant 0 : index
      %c1 = arith.constant 1 : index
      %34 = memref.load %arg4[%c0_26, %c1] : memref<1x3xf32, #tpu.memory_space<smem>>
      memref.store %33, %arg4[%c0_26, %c1] : memref<1x3xf32, #tpu.memory_space<smem>>
      %c0_27 = arith.constant 0 : index
      %c0_28 = arith.constant 0 : index
      %35 = vector.load %arg7[%c0_27, %c0_28] : memref<2x1024xf32, #tpu.memory_space<vmem>>, vector<2x1024xf32>
      %36 = vector.shape_cast %35 : vector<2x1024xf32> to vector<1x2x1024xf32>
      %cst_29 = arith.constant dense<0.000000e+00> : vector<1xf32>
      %37 = vector.multi_reduction <add>, %36, %cst_29 [1, 2] : vector<1x2x1024xf32> to vector<1xf32>
      %38 = vector.shape_cast %37 : vector<1xf32> to vector<1x1x1xf32>
      %39 = vector.extract %38[0, 0, 0] : f32 from vector<1x1x1xf32>
      %c0_30 = arith.constant 0 : index
      %c2 = arith.constant 2 : index
      %40 = memref.load %arg4[%c0_30, %c2] : memref<1x3xf32, #tpu.memory_space<smem>>
      memref.store %39, %arg4[%c0_30, %c2] : memref<1x3xf32, #tpu.memory_space<smem>>
    } else {
    }
    return
  }
  func.func @transform_0(%arg0: i32, %arg1: i32) -> (i32, i32) {
    %c1_i32 = arith.constant 1 : i32
    %0 = arith.muli %arg0, %c1_i32 : i32
    %1 = arith.addi %0, %arg1 : i32
    %c0_i32 = arith.constant 0 : i32
    %2 = arith.minsi %1, %c0_i32 : i32
    %c0_i32_0 = arith.constant 0 : i32
    %c0_i32_1 = arith.constant 0 : i32
    return %2, %c0_i32_0 : i32, i32
  }
  func.func @transform_1(%arg0: i32, %arg1: i32) -> (i32, i32) {
    %c1_i32 = arith.constant 1 : i32
    %0 = arith.muli %arg0, %c1_i32 : i32
    %1 = arith.addi %0, %arg1 : i32
    %c0_i32 = arith.constant 0 : i32
    %2 = arith.minsi %1, %c0_i32 : i32
    %c0_i32_0 = arith.constant 0 : i32
    %c0_i32_1 = arith.constant 0 : i32
    return %2, %c0_i32_0 : i32, i32
  }
  func.func @transform_2(%arg0: i32, %arg1: i32) -> (i32, i32) {
    %c0_i32 = arith.constant 0 : i32
    %c0_i32_0 = arith.constant 0 : i32
    return %arg0, %c0_i32 : i32, i32
  }
}

</mosaic_0001>

<bundles_post_ra>
// kernel: tpu_custom_call.1
= control target key start
LH: loop header
LB: loop body
LE: loop exit
PB: predicated region body
PF: predicated region fallthrough
CT: control target
= control target key end

     0   :  { %7 = vsyncpa [#allocation6], 0  ;;  %s438_s0 = inlined_call_operand.hbm [shape: f32[2,1024], index: 0, kind: input, shape index: {}]   ;;  %s439_s1 = inlined_call_operand.hbm [shape: f32[2,1024], index: 1, kind: input, shape index: {}]   ;;  %s440_s2 = inlined_call_operand.hbm [shape: f32[1,3], index: 2, kind: output, shape index: {}]  }
   0x1   :  { %8 = vsyncpa [#allocation9], 0 }
   0x2   :  { %9 = vsyncpa [#allocation7], 0  ;;  %s21_s11 = sshll.u32 %s438_s0, 4  ;;  %s387_s12 = smov [#allocation5]   ;;  %s22_s11 = int_to_ptr.hbm [resolvable:$true] %s21_s11 }
   0x3   :  { %s23_s13 = sshll.u32 %s387_s12, 4  ;;  %s38_s16 = sshll.u32 %s439_s1, 4  ;;  %s24_s13 = int_to_ptr.vmem [resolvable:$true] %s23_s13  ;;  %s39_s16 = int_to_ptr.hbm [resolvable:$true] %s38_s16 }
   0x4   :  { %26 = dma.hbm_to_vmem [thread:$0]  %s22_s11, 256, %s24_s13, [#allocation6]  }
   0x5   :  { %s388_s17 = smov [#allocation8]  }
   0x6   :  { %s40_s18 = sshll.u32 %s388_s17, 4  ;;  %s41_s18 = int_to_ptr.vmem [resolvable:$true] %s40_s18 }
   0x7   :  { %43 = dma.hbm_to_vmem [thread:$0]  %s39_s16, 256, %s41_s18, [#allocation9]  }
   0x8   :  { %381 = dma.done.wait [#allocation6], 256  }
   0x9   :  { %382 = vsyncadd [#allocation6], 4294967040 }
   0xa   :  { %383 = dma.done.wait [#allocation9], 256  }
   0xb   :  { %384 = vsyncadd [#allocation9], 4294967040  ;;  %v68_v0 = vld [vmem:[#allocation5] sm:$0xff]  ;;  %v69_v1 = vld [vmem:[#allocation5 + $0x8] sm:$0xff]  ;;  %vm156_vm8 = vcmask 1041408   ;;  %s286_s21 = sshll.u32 %s440_s2, 4  ;;  %s287_s21 = int_to_ptr.hbm [resolvable:$true] %s286_s21 }
   0xc   :  { %v302_v2 = vmul.f32 -1.442695, %v68_v0  ;;  %v303_v3 = vmul.f32 -1.442695, %v69_v1  ;;  %v108_v24 = vld [vmem:[#allocation8] sm:$0xff]  ;;  %v109_v26 = vld [vmem:[#allocation8 + $0x8] sm:$0xff] }
   0xd   :  { %s389_s23 = smov [#allocation10]  }
   0xe   :  { %313 = vpow2.f32 %v302_v2 }
   0xf   :  { %315 = vpow2.f32 %v303_v3 }
  0x14   :  { %v314_v4 = vpop.eup %313 }
  0x15   :  { %v316_v5 = vpop.eup %315  ;;  %v76_v6 = vadd.f32 1.0, %v314_v4 }
  0x16   :  { %v77_v7 = vadd.f32 1.0, %v316_v5 }
  0x17   :  { %317 = vrcp.f32 %v76_v6  ;;  %vm83_vm0 = vweird.f32 %v76_v6  ;;  %v89_v11 = vand.u32 2147483648, %v76_v6  ;;  %v87_v14 = vand.u32 2147483647, %v76_v6 }
  0x18   :  { %319 = vrcp.f32 %v77_v7  ;;  %v104_v15 = vand.u32 2147483648, %v77_v7  ;;  %vm98_vm2 = vweird.f32 %v77_v7  ;;  %v102_v17 = vand.u32 2147483647, %v77_v7 }
  0x19   :  { %v90_v19 = vor.u32 1.1754944e-38, %v89_v11  ;;  %vm88_vm5 = vcmp.eq.f32.partialorder %v87_v14, 8.507059e+37 }
  0x1a   :  { %v105_v22 = vor.u32 1.1754944e-38, %v104_v15  ;;  %vm103_vm7 = vcmp.eq.f32.partialorder %v102_v17, 8.507059e+37 }
  0x1d   :  { %v318_v8 = vpop.eup %317 }
  0x1e   :  { %v320_v9 = vpop.eup %319  ;;  %v79_v10 = vmul.f32 %v318_v8, %v76_v6  ;;  %vm84_vm1 = vweird.f32 %v318_v8 }
  0x1f   :  { %v94_v12 = vmul.f32 %v320_v9, %v77_v7  ;;  %vm99_vm3 = vweird.f32 %v320_v9  ;;  %vm85_vm4 = vmor %vm83_vm0, %vm84_vm1 }
  0x20   :  { %v80_v13 = vsub.f32 1.0, %v79_v10  ;;  %vm100_vm6 = vmor %vm98_vm2, %vm99_vm3 }
  0x21   :  { %v95_v16 = vsub.f32 1.0, %v94_v12 }
  0x22   :  { %v81_v18 = vmul.f32 %v318_v8, %v80_v13 }
  0x23   :  { %v96_v20 = vmul.f32 %v320_v9, %v95_v16 }
  0x24   :  { %v82_v21 = vadd.f32 %v318_v8, %v81_v18 }
  0x25   :  { %v97_v23 = vadd.f32 %v320_v9, %v96_v20 }
  0x26   :  { %v86_v25 = vsel %vm85_vm4, %v318_v8, %v82_v21 }
  0x27   :  { %v91_v27 = vsel %vm88_vm5, %v90_v19, %v86_v25  ;;  %v101_v28 = vsel %vm100_vm6, %v320_v9, %v97_v23 }
  0x28   :  { %v106_v29 = vsel %vm103_vm7, %v105_v22, %v101_v28  ;;  %v110_v30 = vmul.f32 %v108_v24, %v91_v27 }
  0x29   :  { %v111_v31 = vmul.f32 %v109_v26, %v106_v29 }
  0x2a   :  { %137 = vst [vmem:[#allocation1] ss:$4 sm:$0xff] %v110_v30 }
  0x2b   :  { %139 = vst [vmem:[#allocation1 + $0x20] ss:$4 sm:$0xff] %v111_v31 }
  0x31   :  { %v140_v32 = vld.sshfl [vmem:[#allocation1] sm:$0xff pattern:$0x73625140]  ;;  %v141_v33 = vld.sshfl [vmem:[#allocation1 + $0x8] sm:$0xff pattern:$0x73625140] }
  0x32   :  { %v142_v34 = vld.sshfl [vmem:[#allocation1 + $0x10] sm:$0xff pattern:$0x73625140]  ;;  %v143_v35 = vld.sshfl [vmem:[#allocation1 + $0x18] sm:$0xff pattern:$0x73625140] }
  0x33   :  { %v144_v36 = vld.sshfl [vmem:[#allocation1 + $0x20] sm:$0xff pattern:$0x73625140]  ;;  %v145_v37 = vld.sshfl [vmem:[#allocation1 + $0x28] sm:$0xff pattern:$0x73625140] }
  0x34   :  { %v146_v38 = vld.sshfl [vmem:[#allocation1 + $0x30] sm:$0xff pattern:$0x73625140]  ;;  %v147_v39 = vld.sshfl [vmem:[#allocation1 + $0x38] sm:$0xff pattern:$0x73625140] }
  0x35   :  { %v157_v40 = vsel %vm156_vm8, %v140_v32, 0.0  ;;  %v158_v41 = vsel %vm156_vm8, %v141_v33, 0.0  ;;  %v160_v42 = vsel %vm156_vm8, %v142_v34, 0.0  ;;  %187 = vst [vmem:[#allocation1] ss:$4 sm:$0xff] %v91_v27  ;;  %v162_v44 = vsel %vm156_vm8, %v143_v35, 0.0 }
  0x36   :  { %v159_v43 = vadd.f32 %v158_v41, %v157_v40  ;;  %189 = vst [vmem:[#allocation1 + $0x20] ss:$4 sm:$0xff] %v106_v29  ;;  %v164_v46 = vsel %vm156_vm8, %v144_v36, 0.0  ;;  %v166_v48 = vsel %vm156_vm8, %v145_v37, 0.0  ;;  %v168_v49 = vsel %vm156_vm8, %v146_v38, 0.0 }
  0x37   :  { %v170_v50 = vsel %vm156_vm8, %v147_v39, 0.0 }
  0x38   :  { %v161_v45 = vadd.f32 %v160_v42, %v159_v43 }
  0x3a   :  { %v163_v47 = vadd.f32 %v162_v44, %v161_v45 }
  0x3c   :  { %v165_v51 = vadd.f32 %v164_v46, %v163_v47  ;;  %v190_v52 = vld.sshfl [vmem:[#allocation1] sm:$0xff pattern:$0x73625140]  ;;  %v191_v53 = vld.sshfl [vmem:[#allocation1 + $0x8] sm:$0xff pattern:$0x73625140] }
  0x3d   :  { %v192_v54 = vld.sshfl [vmem:[#allocation1 + $0x10] sm:$0xff pattern:$0x73625140]  ;;  %v193_v55 = vld.sshfl [vmem:[#allocation1 + $0x18] sm:$0xff pattern:$0x73625140] }
  0x3e   :  { %v167_v56 = vadd.f32 %v166_v48, %v165_v51  ;;  %v194_v57 = vld.sshfl [vmem:[#allocation1 + $0x20] sm:$0xff pattern:$0x73625140]  ;;  %v195_v58 = vld.sshfl [vmem:[#allocation1 + $0x28] sm:$0xff pattern:$0x73625140] }
  0x3f   :  { %v196_v59 = vld.sshfl [vmem:[#allocation1 + $0x30] sm:$0xff pattern:$0x73625140]  ;;  %v197_v60 = vld.sshfl [vmem:[#allocation1 + $0x38] sm:$0xff pattern:$0x73625140] }
  0x40   :  { %v169_v61 = vadd.f32 %v168_v49, %v167_v56  ;;  %v206_v62 = vsel %vm156_vm8, %v190_v52, 0.0  ;;  %v207_v63 = vsel %vm156_vm8, %v191_v53, 0.0  ;;  %v209_v0 = vsel %vm156_vm8, %v192_v54, 0.0  ;;  %236 = vst [vmem:[#allocation1] ss:$4 sm:$0xff] %v108_v24 }
  0x41   :  { %v208_v1 = vadd.f32 %v207_v63, %v206_v62  ;;  %238 = vst [vmem:[#allocation1 + $0x20] ss:$4 sm:$0xff] %v109_v26  ;;  %v211_v3 = vsel %vm156_vm8, %v193_v55, 0.0  ;;  %v213_v5 = vsel %vm156_vm8, %v194_v57, 0.0  ;;  %v215_v7 = vsel %vm156_vm8, %v195_v58, 0.0 }
  0x42   :  { %v171_v2 = vadd.f32 %v170_v50, %v169_v61  ;;  %v217_v9 = vsel %vm156_vm8, %v196_v59, 0.0  ;;  %v219_v14 = vsel %vm156_vm8, %v197_v60, 0.0 }
  0x43   :  { %v210_v4 = vadd.f32 %v209_v0, %v208_v1 }
  0x44   :  { %172 = vadd.xlane.f32.xlu0 %v171_v2 }
  0x45   :  { %v212_v6 = vadd.f32 %v211_v3, %v210_v4 }
  0x47   :  { %v214_v8 = vadd.f32 %v213_v5, %v212_v6  ;;  %v239_v10 = vld.sshfl [vmem:[#allocation1] sm:$0xff pattern:$0x73625140]  ;;  %v240_v11 = vld.sshfl [vmem:[#allocation1 + $0x8] sm:$0xff pattern:$0x73625140] }
  0x48   :  { %v241_v12 = vld.sshfl [vmem:[#allocation1 + $0x10] sm:$0xff pattern:$0x73625140]  ;;  %v242_v15 = vld.sshfl [vmem:[#allocation1 + $0x18] sm:$0xff pattern:$0x73625140] }
  0x49   :  { %v216_v13 = vadd.f32 %v215_v7, %v214_v8  ;;  %v255_v17 = vsel %vm156_vm8, %v239_v10, 0.0  ;;  %v256_v18 = vsel %vm156_vm8, %v240_v11, 0.0  ;;  %v258_v19 = vsel %vm156_vm8, %v241_v12, 0.0  ;;  %v243_v20 = vld.sshfl [vmem:[#allocation1 + $0x20] sm:$0xff pattern:$0x73625140] }
  0x4a   :  { %v257_v21 = vadd.f32 %v256_v18, %v255_v17  ;;  %v260_v23 = vsel %vm156_vm8, %v242_v15, 0.0  ;;  %v244_v24 = vld.sshfl [vmem:[#allocation1 + $0x28] sm:$0xff pattern:$0x73625140]  ;;  %v262_v26 = vsel %vm156_vm8, %v243_v20, 0.0 }
  0x4b   :  { %v218_v16 = vadd.f32 %v217_v9, %v216_v13  ;;  %v245_v27 = vld.sshfl [vmem:[#allocation1 + $0x30] sm:$0xff pattern:$0x73625140]  ;;  %v264_v29 = vsel %vm156_vm8, %v244_v24, 0.0 }
  0x4c   :  { %v259_v25 = vadd.f32 %v258_v19, %v257_v21  ;;  %v246_v30 = vld.sshfl [vmem:[#allocation1 + $0x38] sm:$0xff pattern:$0x73625140]  ;;  %v266_v32 = vsel %vm156_vm8, %v245_v27, 0.0 }
  0x4d   :  { %v220_v22 = vadd.f32 %v219_v14, %v218_v16  ;;  %v268_v34 = vsel %vm156_vm8, %v246_v30, 0.0 }
  0x4e   :  { %v261_v28 = vadd.f32 %v260_v23, %v259_v25 }
  0x4f   :  { %221 = vadd.xlane.f32.xlu0 %v220_v22 }
  0x50   :  { %v263_v31 = vadd.f32 %v262_v26, %v261_v28 }
  0x52   :  { %v265_v33 = vadd.f32 %v264_v29, %v263_v31 }
  0x54   :  { %v267_v35 = vadd.f32 %v266_v32, %v265_v33 }
  0x56   :  { %v269_v36 = vadd.f32 %v268_v34, %v267_v35 }
  0x58   :  { %270 = vadd.xlane.f32.xlu1 %v269_v36 }
  0xb7   :  { %v173_v37 = vpop.xlane.xlu0 %172 }
  0xb8   :  { %v174_v38 = vrot.slane %v173_v37, 4 }
  0xba   :  { %v175_v39 = vadd.f32 %v174_v38, %v173_v37 }
  0xbc   :  { %v176_v40 = vrot.slane %v175_v39, 2 }
  0xbe   :  { %v177_v41 = vadd.f32 %v176_v40, %v175_v39 }
  0xc0   :  { %v178_v42 = vrot.slane %v177_v41, 1 }
  0xc2   :  { %v222_v43 = vpop.xlane.xlu0 %221  ;;  %v179_v44 = vadd.f32 %v178_v42, %v177_v41 }
  0xc3   :  { %v223_v45 = vrot.slane %v222_v43, 4 }
  0xc4   :  { %304 = vpush %v179_v44 }
  0xc5   :  { %v224_v46 = vadd.f32 %v223_v45, %v222_v43 }
  0xc7   :  { %v225_v47 = vrot.slane %v224_v46, 2 }
  0xc9   :  { %v226_v48 = vadd.f32 %v225_v47, %v224_v46 }
  0xcb   :  { %v227_v49 = vrot.slane %v226_v48, 1  ;;  %v271_v50 = vpop.xlane.xlu1 %270 }
  0xcc   :  { %v272_v52 = vrot.slane %v271_v50, 4 }
  0xcd   :  { %v228_v51 = vadd.f32 %v227_v49, %v226_v48 }
  0xce   :  { %v273_v53 = vadd.f32 %v272_v52, %v271_v50 }
  0xcf   :  { %306 = vpush %v228_v51 }
  0xd0   :  { %v274_v54 = vrot.slane %v273_v53, 2 }
  0xd2   :  { %v275_v55 = vadd.f32 %v274_v54, %v273_v53 }
  0xd4   :  { %v276_v56 = vrot.slane %v275_v55, 1 }
  0xd6   :  { %v277_v57 = vadd.f32 %v276_v56, %v275_v55 }
  0xd8   :  { %308 = vpush %v277_v57 }
  0xf5   :  { %s305_s0 = spop %304 }
  0xf6   :  { %182 = sst [smem:[#allocation10]] %s305_s0 }
 0x100   :  { %s307_s1 = spop %306 }
 0x101   :  { %231 = sst [smem:[#allocation10 + $0x1]] %s307_s1 }
 0x109   :  { %s309_s22 = spop %308 }
 0x10a   :  { %280 = sst [smem:[#allocation10 + $0x2]] %s309_s22 }
 0x10b   :  { %289 = dma.smem_to_hbm %s389_s23, 16, %s287_s21, [#allocation7]  }
 0x10c   :  { %385 = dma.done.wait [#allocation7], 16  }
 0x10d   :  { %386 = vsyncadd [#allocation7], 4294967280 }
 0x10e   :  { %294 = sfence }
 0x10f   :  { %295 = vsyncpa [#allocation6], 1 }
 0x110   :  { %296 = vsyncpa [#allocation9], 1 }
 0x111   :  { %297 = vsyncpa [#allocation7], 1 }

</bundles_post_ra>
